<compile_context>
chip_gen: v7x
topology: tpu7x:2x2x1
jax: 0.10.0
libtpu: 0.0.40
codegen_flags: <defaults>
</compile_context>

<pallas_src>
import numpy as np
import jax
import jax.numpy as jnp
from jax import lax
from jax.experimental import pallas as pl
from jax.experimental.pallas import tpu as pltpu


# -----------------------------------------------------------------------------
# Image blend kernel:
#   out[b, c, p] = images[index[b], c, p] if pixel p is inside the cut box
#                  images[b, c, p]        otherwise
# processed on the flattened spatial axis p = row * D1 + col.
# -----------------------------------------------------------------------------
def _make_image_kernel(d1, tile_s):
    """d1 = size of the last image axis, tile_s = flattened-spatial tile size."""
    d1_pow2 = (d1 & (d1 - 1)) == 0

    def kernel(idx_ref, bbox_ref, tb_ref, img_ref, img_perm_ref, out_ref):
        # idx_ref / tb_ref are only consumed by the index_maps.
        del idx_ref, tb_ref
        t = pl.program_id(1)
        bbx1 = bbox_ref[0]   # axis -2 range [bbx1, bbx2)
        bbx2 = bbox_ref[1]
        bby1 = bbox_ref[2]   # axis -1 range [bby1, bby2)
        bby2 = bbox_ref[3]

        # Mask built once at (1, 1, tile_s) and broadcast across channels.
        flat = t * tile_s + lax.broadcasted_iota(jnp.int32, (1, 1, tile_s), 2)
        # row = flat // d1 in [bbx1, bbx2)  <=>  flat in [bbx1*d1, bbx2*d1)
        row_ok = (flat >= bbx1 * d1) & (flat < bbx2 * d1)
        col = (flat & (d1 - 1)) if d1_pow2 else (flat % d1)
        col_ok = (col >= bby1) & (col < bby2)
        in_box = (row_ok & col_ok).astype(jnp.int32)            # (1, 1, tile_s)
        in_box_full = jnp.broadcast_to(in_box, img_ref.shape)   # (1, C, tile_s)

        out_ref[...] = jnp.where(in_box_full != 0, img_perm_ref[...], img_ref[...])

    return kernel


# -----------------------------------------------------------------------------
# Label mix kernel (single grid-less call):
#   labels_out = lam * labels + (1 - lam) * labels[index]
# The permutation is applied as a one-hot permutation matmul (fully vectorized,
# no per-row gather loop, no per-batch-element grid steps).
# -----------------------------------------------------------------------------
def _cutmix_label_kernel(idx_col_ref, lam_ref, lab_ref, out_ref):
    bsz = lab_ref.shape[0]
    lam = lam_ref[0]
    col_ids = lax.broadcasted_iota(jnp.int32, (bsz, bsz), 1)
    perm_mat = (col_ids == idx_col_ref[...]).astype(jnp.float32)  # row i one-hot at index[i]
    lab = lab_ref[...].astype(jnp.float32)
    permuted = jnp.dot(perm_mat, lab, preferred_element_type=jnp.float32)
    out_ref[...] = (lam * lab + (1.0 - lam) * permuted).astype(out_ref.dtype)


def _pick_spatial_tile(num_channels, spatial, itemsize, budget_bytes=8 * 1024 * 1024):
    """Largest tile of the flattened H*W axis whose pipelined working set
    (img + img_perm + out, double buffered = 6 buffers) fits the VMEM budget,
    subject to the layout rule: tile % 128 == 0 or tile == full axis.
    The 8 MiB default keeps v5e's 16 MiB scoped-VMEM default happy; v6e/v7x
    have more headroom."""
    per_elem = 6 * num_channels * itemsize
    if per_elem * spatial <= budget_bytes or spatial % 128 != 0:
        return spatial
    max_k = max(1, budget_bytes // (per_elem * 128))
    for k in range(min(max_k, spatial // 128), 0, -1):
        if spatial % (128 * k) == 0:
            return 128 * k
    return spatial


def cutmix_pallas(images, labels, index, bbox, lam, *, spatial_tile=None):
    """images: (B, C, D2, D1), labels: (B, NC), index: (B,) int,
    bbox: (4,) int32 [bbx1, bbx2, bby1, bby2] (axis -2 / axis -1 bounds),
    lam: python float or 0-d array."""
    B, C, D2, D1 = images.shape
    NC = labels.shape[-1]
    S = D2 * D1

    tile_s = spatial_tile if spatial_tile is not None else _pick_spatial_tile(
        C, S, jnp.dtype(images.dtype).itemsize)
    assert S % tile_s == 0 and (tile_s == S or tile_s % 128 == 0), (S, tile_s)
    n_tiles = S // tile_s

    imgs_flat = images.reshape(B, C, S)             # row-major reshape (cheap)
    idx = index.astype(jnp.int32)
    bbox = jnp.asarray(bbox, dtype=jnp.int32)
    lam_arr = jnp.asarray(lam, dtype=jnp.float32).reshape(1)

    # Spatial tiles that can contain box pixels.  Grid steps outside this range
    # clamp the permuted-image block index into it, so the pipeline re-uses the
    # previously fetched block and skips the permuted-image HBM read.
    row_lo = bbox[0] * D1
    row_hi = bbox[1] * D1
    t_lo = jnp.clip(row_lo // tile_s, 0, n_tiles - 1)
    t_hi = jnp.clip((jnp.maximum(row_hi, 1) - 1) // tile_s, 0, n_tiles - 1)
    t_hi = jnp.maximum(t_hi, t_lo)
    tile_bounds = jnp.stack([t_lo, t_hi]).astype(jnp.int32)

    grid_spec = pltpu.PrefetchScalarGridSpec(
        num_scalar_prefetch=3,
        grid=(B, n_tiles),
        in_specs=[
            # this batch element (always needed)
            pl.BlockSpec((1, C, tile_s), lambda b, t, idx, bbox, tb: (b, 0, t)),
            # permuted batch element: only box-intersecting spatial tiles
            pl.BlockSpec((1, C, tile_s),
                         lambda b, t, idx, bbox, tb:
                         (idx[b], 0, jnp.clip(t, tb[0], tb[1]))),
        ],
        out_specs=pl.BlockSpec((1, C, tile_s), lambda b, t, idx, bbox, tb: (b, 0, t)),
    )

    img_out = pl.pallas_call(
        _make_image_kernel(D1, tile_s),
        grid_spec=grid_spec,
        out_shape=jax.ShapeDtypeStruct((B, C, S), images.dtype),
        compiler_params=pltpu.CompilerParams(
            # batch axis "parallel" -> v7x megacore shards it across both TCs
            dimension_semantics=("parallel", "arbitrary"),
            vmem_limit_bytes=32 * 1024 * 1024,
        ),
    )(idx, bbox, tile_bounds, imgs_flat, imgs_flat)

    lab_out = pl.pallas_call(
        _cutmix_label_kernel,
        out_shape=jax.ShapeDtypeStruct((B, NC), labels.dtype),
        in_specs=[
            pl.BlockSpec(memory_space=pltpu.MemorySpace.VMEM),   # index as (B, 1) column
            pl.BlockSpec(memory_space=pltpu.MemorySpace.SMEM),   # lam scalar
            pl.BlockSpec(memory_space=pltpu.MemorySpace.VMEM),   # labels
        ],
        out_specs=pl.BlockSpec(memory_space=pltpu.MemorySpace.VMEM),
    )(idx.reshape(B, 1), lam_arr, labels)

    return img_out.reshape(B, C, D2, D1), lab_out


class CutMixPallas:
    """JAX/Pallas port of the CutMix nn.Module forward."""

    def __init__(self, num_classes, alpha=1.0, is_mixmatch=False):
        self.alpha = alpha
        self.num_classes = num_classes
        self.is_mixmatch = is_mixmatch
        self.last_bbox = None

    def __call__(self, images, labels, np_rng, jax_key):
        bs = images.shape[0]
        if self.alpha > 0:
            lam = float(np_rng.beta(self.alpha, self.alpha))
        else:
            lam = 1.0
        if self.is_mixmatch:
            lam = max(lam, 1.0 - lam)
        # Reference naming: W = axis -2, H = axis -1 (names swapped, semantics kept).
        W_, H_ = images.shape[-2], images.shape[-1]
        cut_rat = np.sqrt(1.0 - lam)
        cut_w = int(W_ * cut_rat)
        cut_h = int(H_ * cut_rat)
        cx = int(np_rng.integers(W_))
        cy = int(np_rng.integers(H_))
        bbx1 = int(np.clip(cx - cut_w // 2, 0, W_))
        bby1 = int(np.clip(cy - cut_h // 2, 0, H_))
        bbx2 = int(np.clip(cx + cut_w // 2, 0, W_))
        bby2 = int(np.clip(cy + cut_h // 2, 0, H_))
        index = jax.random.permutation(jax_key, bs)          # torch.randperm(bs)
        lam = 1.0 - (bbx2 - bbx1) * (bby2 - bby1) / (W_ * H_)
        self.last_bbox = (bbx1, bbx2, bby1, bby2)
        bbox = jnp.array([bbx1, bbx2, bby1, bby2], dtype=jnp.int32)

        images_out, labels_out = cutmix_pallas(images, labels, index, bbox, lam)
        return images_out, labels_out, lam, index


if __name__ == "__main__":
    B, C, SP, NC = 2, 4, 16, 10

    key = jax.random.PRNGKey(0)
    k_img, k_lab, k_perm = jax.random.split(key, 3)
    images = jax.random.normal(k_img, (B, C, SP, SP), dtype=jnp.float32)
    labels = jax.nn.one_hot(
        jax.random.randint(k_lab, (B,), 0, NC), NC, dtype=jnp.float32)
    np_rng = np.random.default_rng(0)   # deterministic beta / box-center draws

    cutmix = CutMixPallas(num_classes=NC, alpha=1.0, is_mixmatch=False)
    images_out, labels_out, lam, index = cutmix(images, labels, np_rng, k_perm)
    jax.block_until_ready((images_out, labels_out, index))

    # Plain-numpy reference for exactly the box / permutation the module drew.
    bbx1, bbx2, bby1, bby2 = cutmix.last_bbox
    idx_np = np.asarray(index)
    img_np = np.asarray(images)
    lab_np = np.asarray(labels)
    img_ref = img_np.copy()
    img_ref[:, :, bbx1:bbx2, bby1:bby2] = img_np[idx_np, :, bbx1:bbx2, bby1:bby2]
    lab_ref = lam * lab_np + (1.0 - lam) * lab_np[idx_np]
    np.testing.assert_allclose(np.asarray(images_out), img_ref, rtol=1e-6, atol=1e-6)
    np.testing.assert_allclose(np.asarray(labels_out), lab_ref, rtol=1e-6, atol=1e-6)

    # Second check: fixed box + forced multi-tile spatial grid.  Exercises the
    # clamped permuted-read index_map (spatial tile 0 is fully outside the box,
    # so its permuted DMA is skipped) and the tiled mask logic.
    index2 = jnp.array([1, 0], dtype=jnp.int32)
    bbx = (9, 14, 2, 9)     # rows [9,14) x cols [2,9) -> entirely inside tile 1
    lam2 = 1.0 - (bbx[1] - bbx[0]) * (bbx[3] - bbx[2]) / float(SP * SP)
    img2, lab2 = cutmix_pallas(images, labels, index2,
                               jnp.array(bbx, dtype=jnp.int32), lam2,
                               spatial_tile=128)
    jax.block_until_ready((img2, lab2))
    idx2_np = np.asarray(index2)
    img2_ref = img_np.copy()
    img2_ref[:, :, bbx[0]:bbx[1], bbx[2]:bbx[3]] = \
        img_np[idx2_np, :, bbx[0]:bbx[1], bbx[2]:bbx[3]]
    lab2_ref = lam2 * lab_np + (1.0 - lam2) * lab_np[idx2_np]
    np.testing.assert_allclose(np.asarray(img2), img2_ref, rtol=1e-6, atol=1e-6)
    np.testing.assert_allclose(np.asarray(lab2), lab2_ref, rtol=1e-6, atol=1e-6)

    print("KERNEL_OK")
</pallas_src>

<mosaic_0001>
module attributes {stable_mosaic.version = 11 : i64} {
  func.func @kernel(%arg0: i32, %arg1: i32, %arg2: memref<2xi32, #tpu.memory_space<smem>>, %arg3: memref<4xi32, #tpu.memory_space<smem>>, %arg4: memref<2xi32, #tpu.memory_space<smem>>, %arg5: memref<1x4x256xf32, #tpu.memory_space<vmem>>, %arg6: memref<1x4x256xf32, #tpu.memory_space<vmem>>, %arg7: memref<1x4x256xf32, #tpu.memory_space<vmem>>) attributes {dimension_semantics = [#tpu.dimension_semantics<parallel>, #tpu.dimension_semantics<arbitrary>], iteration_bounds = array<i64: 2, 1>, scalar_prefetch = 3 : i64, scratch_operands = 0 : i64, tpu.core_type = #tpu.core_type<tc>, window_params = [{transform_indices = @transform_0, window_bounds = array<i64: 1, 4, 256>}, {transform_indices = @transform_1, window_bounds = array<i64: 1, 4, 256>}, {transform_indices = @transform_2, window_bounds = array<i64: 1, 4, 256>}]} {
    %c0 = arith.constant 0 : index
    %0 = memref.load %arg3[%c0] : memref<4xi32, #tpu.memory_space<smem>>
    %c1 = arith.constant 1 : index
    %1 = memref.load %arg3[%c1] : memref<4xi32, #tpu.memory_space<smem>>
    %c2 = arith.constant 2 : index
    %2 = memref.load %arg3[%c2] : memref<4xi32, #tpu.memory_space<smem>>
    %c3 = arith.constant 3 : index
    %3 = memref.load %arg3[%c3] : memref<4xi32, #tpu.memory_space<smem>>
    %c256_i32 = arith.constant 256 : i32
    %4 = arith.muli %arg1, %c256_i32 : i32
    %5 = tpu.iota {dimensions = array<i32: 2>} : vector<1x1x256xi32>
    %6 = vector.broadcast %4 : i32 to vector<1x1x256xi32>
    %7 = arith.addi %6, %5 : vector<1x1x256xi32>
    %c16_i32 = arith.constant 16 : i32
    %8 = arith.muli %0, %c16_i32 : i32
    %9 = vector.broadcast %8 : i32 to vector<1x1x256xi32>
    %10 = arith.cmpi sge, %7, %9 : vector<1x1x256xi32>
    %c16_i32_0 = arith.constant 16 : i32
    %11 = arith.muli %1, %c16_i32_0 : i32
    %12 = vector.broadcast %11 : i32 to vector<1x1x256xi32>
    %13 = arith.cmpi slt, %7, %12 : vector<1x1x256xi32>
    %14 = arith.andi %10, %13 : vector<1x1x256xi1>
    %c15_i32 = arith.constant 15 : i32
    %15 = vector.broadcast %c15_i32 : i32 to vector<1x1x256xi32>
    %16 = arith.andi %7, %15 : vector<1x1x256xi32>
    %17 = vector.broadcast %2 : i32 to vector<1x1x256xi32>
    %18 = arith.cmpi sge, %16, %17 : vector<1x1x256xi32>
    %19 = vector.broadcast %3 : i32 to vector<1x1x256xi32>
    %20 = arith.cmpi slt, %16, %19 : vector<1x1x256xi32>
    %21 = arith.andi %18, %20 : vector<1x1x256xi1>
    %22 = arith.andi %14, %21 : vector<1x1x256xi1>
    %23 = arith.extui %22 : vector<1x1x256xi1> to vector<1x1x256xi32>
    %24 = vector.shape_cast %23 : vector<1x1x256xi32> to vector<1x1x256xi32>
    %25 = vector.broadcast %24 : vector<1x1x256xi32> to vector<1x4x256xi32>
    %c0_i32 = arith.constant 0 : i32
    %26 = vector.broadcast %c0_i32 : i32 to vector<1x4x256xi32>
    %27 = arith.cmpi ne, %25, %26 : vector<1x4x256xi32>
    %c0_1 = arith.constant 0 : index
    %c0_2 = arith.constant 0 : index
    %c0_3 = arith.constant 0 : index
    %28 = vector.load %arg6[%c0_1, %c0_2, %c0_3] : memref<1x4x256xf32, #tpu.memory_space<vmem>>, vector<1x4x256xf32>
    %c0_4 = arith.constant 0 : index
    %c0_5 = arith.constant 0 : index
    %c0_6 = arith.constant 0 : index
    %29 = vector.load %arg5[%c0_4, %c0_5, %c0_6] : memref<1x4x256xf32, #tpu.memory_space<vmem>>, vector<1x4x256xf32>
    %30 = arith.select %27, %28, %29 : vector<1x4x256xi1>, vector<1x4x256xf32>
    %c0_7 = arith.constant 0 : index
    %c0_8 = arith.constant 0 : index
    %c0_9 = arith.constant 0 : index
    %31 = vector.load %arg7[%c0_7, %c0_8, %c0_9] : memref<1x4x256xf32, #tpu.memory_space<vmem>>, vector<1x4x256xf32>
    tpu.vector_store %arg7[%c0_7, %c0_8, %c0_9], %30 {strides = array<i32>} : memref<1x4x256xf32, #tpu.memory_space<vmem>>, vector<1x4x256xf32>,
    return
  }
  func.func @transform_0(%arg0: i32, %arg1: i32, %arg2: memref<2xi32, #tpu.memory_space<smem>>, %arg3: memref<4xi32, #tpu.memory_space<smem>>, %arg4: memref<2xi32, #tpu.memory_space<smem>>) -> (i32, i32, i32) {
    %c0_i32 = arith.constant 0 : i32
    %c0_i32_0 = arith.constant 0 : i32
    return %arg0, %c0_i32, %arg1 : i32, i32, i32
  }
  func.func @transform_1(%arg0: i32, %arg1: i32, %arg2: memref<2xi32, #tpu.memory_space<smem>>, %arg3: memref<4xi32, #tpu.memory_space<smem>>, %arg4: memref<2xi32, #tpu.memory_space<smem>>) -> (i32, i32, i32) {
    %0 = arith.index_cast %arg0 : i32 to index
    %1 = memref.load %arg2[%0] : memref<2xi32, #tpu.memory_space<smem>>
    %c0 = arith.constant 0 : index
    %2 = memref.load %arg4[%c0] : memref<2xi32, #tpu.memory_space<smem>>
    %c1 = arith.constant 1 : index
    %3 = memref.load %arg4[%c1] : memref<2xi32, #tpu.memory_space<smem>>
    %4 = arith.maxsi %2, %arg1 : i32
    %5 = arith.minsi %3, %4 : i32
    %c0_i32 = arith.constant 0 : i32
    %c0_i32_0 = arith.constant 0 : i32
    return %1, %c0_i32, %5 : i32, i32, i32
  }
  func.func @transform_2(%arg0: i32, %arg1: i32, %arg2: memref<2xi32, #tpu.memory_space<smem>>, %arg3: memref<4xi32, #tpu.memory_space<smem>>, %arg4: memref<2xi32, #tpu.memory_space<smem>>) -> (i32, i32, i32) {
    %c0_i32 = arith.constant 0 : i32
    %c0_i32_0 = arith.constant 0 : i32
    return %arg0, %c0_i32, %arg1 : i32, i32, i32
  }
}

</mosaic_0001>

<bundles_post_ra>
// kernel: tpu_custom_call.1
= control target key start
LH: loop header
LB: loop body
LE: loop exit
PB: predicated region body
PF: predicated region fallthrough
CT: control target
= control target key end

     0   :  { %s1144_s0 = inlined_call_operand.hbm [shape: s32[2], index: 0, kind: input, shape index: {}]   ;;  %s1145_s3 = inlined_call_operand.hbm [shape: f32[2,4,256], index: 3, kind: input, shape index: {}]   ;;  %s1146_s4 = inlined_call_operand.hbm [shape: f32[2,4,256], index: 4, kind: input, shape index: {}]   ;;  %s1147_s5 = inlined_call_operand.hbm [shape: f32[2,4,256], index: 5, kind: output, shape index: {}]   ;;  %s1148_s1 = inlined_call_operand.vmem [shape: s32[4], index: 1, kind: input, shape index: {}]   ;;  %s1149_s2 = inlined_call_operand.vmem [shape: s32[2], index: 2, kind: input, shape index: {}]  }
   0x1   :  { %1157 = sst [smem:[#allocation21_spill]] %s1145_s3  ;;  %s571_s20 = scalar_lea.hbm %s1144_s0, 16 }
   0x2   :  { %p572_p0 = scmp.ne.s32.totalorder %s1144_s0, %s571_s20  ;;  %p575_p1 = scmp.lt.u32.totalorder %s571_s20, %s1144_s0 }
   0x4   :  { %p577_p2 = pnand %p575_p1, %p572_p0 }
   0x6   :  { %580 = shalt.err (!%p577_p2)  }
   0x7   :  { %s779_s25 = smov [#allocation3]   ;;  %s12_s30 = sshll.u32 %s1148_s1, 4  ;;  %s13_s30 = int_to_ptr.vmem [resolvable:$true] %s12_s30 }
   0x8   :  { %11 = dma.hbm_to_smem %s1144_s0, 16, %s779_s25, [#allocation2] }
   0x9   :  { %s16_s8 = sshll.u32 %s1149_s2, 4  ;;  %s581_s9 = scalar_lea.vmem %s13_s30, 16  ;;  %s17_s8 = int_to_ptr.vmem [resolvable:$true] %s16_s8 }
   0xa   :  { %p582_p3 = scmp.ne.s32.totalorder %s13_s30, %s581_s9  ;;  %p586_p4 = scmp.lt.s32.totalorder %s13_s30, %s13_s30 }
   0xb   :  { %p587_p5 = scmp.lt.s32.totalorder %s581_s9, %s581_s9 }
   0xd   :  { %p588_p6 = por %p587_p5, %p586_p4 }
   0xf   :  { %p589_p7 = pnand %p588_p6, %p582_p3 }
  0x11   :  { %592 = shalt.err (!%p589_p7)  }
  0x12   :  { %s780_s10 = smov [#allocation4]   ;;  %s593_s0 = scalar_lea.vmem %s17_s8, 16 }
  0x13   :  { %15 = dma.vmem_to_smem %s13_s30, 16, %s780_s10, [#allocation2] }
  0x14   :  { %p594_p8 = scmp.ne.s32.totalorder %s17_s8, %s593_s0  ;;  %p598_p9 = scmp.lt.s32.totalorder %s17_s8, %s17_s8 }
  0x15   :  { %p599_p10 = scmp.lt.s32.totalorder %s593_s0, %s593_s0 }
  0x17   :  { %p600_p11 = por %p599_p10, %p598_p9 }
  0x19   :  { %p601_p12 = pnand %p600_p11, %p594_p8 }
  0x1b   :  { %604 = shalt.err (!%p601_p12)  }
  0x1c   :  { %s781_s1 = smov [#allocation5]  }
  0x1d   :  { %19 = dma.vmem_to_smem %s17_s8, 16, %s781_s1, [#allocation2] }
  0x1e   :  { %729 = dma.done.wait [#allocation2], 48 }
  0x1f   :  { %730 = vsyncadd [#allocation2], 4294967248 }
  0x20   :  { %21 = sfence }
  0x21   :  { %22 = vsyncpa [#allocation7], 0 }
  0x22   :  { %24 = vsyncpa [#allocation7 + $0x1], 0 }
  0x23   :  { %25 = vsyncpa [#allocation10], 0 }
  0x24   :  { %27 = vsyncpa [#allocation10 + $0x1], 0 }
  0x25   :  { %28 = vsyncpa [#allocation8], 0 }
  0x26   :  { %30 = vsyncpa [#allocation8 + $0x1], 0  ;;  %s833_s2 = smov 0   ;;  %s835_s11 = smov 0  }
  0x27   :  { %s837_s12 = smov 0   ;;  %s839_s13 = smov 0  }
  0x28   :  { %s841_s14 = smov 0   ;;  %s843_s15 = smov 0  }
  0x29   :  { %s845_s16 = smov 0   ;;  %s847_s17 = smov 0  }
  0x2a   :  { %s849_s18 = smov 0  }
  0x2b LB: > { %1158 = sst [smem:[#allocation18_spill]] %s773_s17  ;;  %s441_s19 = sadd.s32 4294967295, %s777_s18   ;;  %s777_s18 = sphi %s849_s18, %s36_s18   ;;  %s773_s17 = sphi %s847_s17, %s1185_s17   ;;  %s769_s16 = sphi %s845_s16, %s1184_s16   ;;  %s765_s15 = sphi %s843_s15, %s1191_s15   ;;  %s761_s14 = sphi %s841_s14, %s1190_s14   ;;  %s757_s13 = sphi %s839_s13, %s1189_s13   ;;  %s753_s12 = sphi %s837_s12, %s1188_s12   ;;  %s749_s11 = sphi %s835_s11, %s1187_s11   ;;  %s745_s2 = sphi %s833_s2, %s1186_s2  }
  0x2c   : > { %s442_s20 = sadd.s32 4294967294, %s777_s18   ;;  %s48_s21 = sadd.s32 1, %s773_s17 }
  0x2d   : > { %s57_s22 = sadd.s32 1, %s765_s15  ;;  %p50_p13 = scmp.ge.s32.totalorder %s48_s21, 2 }
  0x2e   : > { %p64_p0 = scmp.ne.s32.totalorder %s765_s15, %s761_s14  ;;  %p1151_p1 = scmp.eq.s32.totalorder %s777_s18, 0 }
  0x2f   : > { %p70_p2 = scmp.ne.s32.totalorder %s761_s14, %s757_s13  ;;  %s1193_s21 = smov (%p50_p13, %s48_s21), 0 }
  0x30   : > { %1159 = sst [smem:[#allocation19_spill]] %s1193_s21  ;;  %p894_p3 = por %p1151_p1, %p64_p0 }
  0x31   : > { %p898_p4 = scmp.eq.s32.totalorder %s441_s19, 0  ;;  %s52_s25 = ssub.s32 %s773_s17, %s1193_s21 }
  0x32   : > { %s905_s26 = sld [smem:[#allocation3 + %s773_s17]]  ;;  %p55_p5 = scmp.eq.s32.totalorder %s52_s25, 0 }
  0x33   : > { %p912_p6 = por %p898_p4, %p70_p2  ;;  %s917_s28 = sld [smem:[#allocation3 + %s1193_s21]] }
  0x34   : > { %p138_p7 = scmp.eq.s32.totalorder %s441_s19, 1  ;;  %p144_p9 = scmp.eq.s32.totalorder %s442_s20, 1 }
  0x35   : > { %s1162_s27 = scalar_select %p912_p6, 1, 0 }
  0x36   : > { %s920_s29 = scalar_select %p55_p5, %s765_s15, %s57_s22  }
  0x37   : > { %p925_p8 = por %p138_p7, %p64_p0  ;;  %p1150_p11 = scmp.lt.s32.totalorder %s777_s18, 2 }
  0x38   : > { %1163 = sst [smem:[#allocation20_spill]] %s920_s29  ;;  %p934_p12 = por %p144_p9, %p70_p2 }
  0x39   : > { %s1164_s30 = scalar_select %p925_p8, 1, 0 }
  0x3a   : > { %s1165_s6 = scalar_select %p934_p12, 1, 0 }
  0x3b   : > { %s164_s7 = sand.u32 1, %s765_s15   ;;  %s469_s9 = sshll.u32 %s773_s17, 7 }
  0x3c   : > { %s447_s8 = sshll.u32 %s164_s7, 3  ;;  %s1166_s3 = sld [smem:[#allocation21_spill]] }
  0x3d   : > { %s168_s19 = scalar_lea.vmem [#allocation6], %s447_s8  ;;  %p951_p13 = pnand %p1150_p11, %p894_p3 }
  0x3e   : > { %s178_s20 = sshll.u32 %s168_s19, 4  ;;  %s165_s25 = scalar_lea.sflag [#allocation7], %s164_s7  ;;  %s945_s20 = int_to_ptr.vmem [resolvable:$true] %s178_s20 }
  0x3f   : > { %p607_p7 = pneg %p951_p13 }
  0x42   : > { %s943_s1 = scalar_lea.hbm %s1166_s3, %s469_s9  ;;  %s610_s10 = scalar_lea.hbm %s1166_s3, 256 }
  0x43   : > { %s605_s9 = scalar_lea.hbm %s943_s1, 128  ;;  %p611_p3 = scmp.lt.u32.totalorder %s943_s1, %s1166_s3 }
  0x44   : > { %p606_p5 = scmp.ne.s32.totalorder %s943_s1, %s605_s9  ;;  %p612_p11 = scmp.lt.u32.totalorder %s610_s10, %s605_s9 }
  0x45   : > { %p614_p0 = scmp.lt.u32.totalorder %s605_s9, %s943_s1 }
  0x46   : > { %p608_p9 = pnand %p607_p7, %p606_p5  ;;  %p613_p1 = por %p612_p11, %p611_p3 }
  0x48   : > { %p609_p10 = pneg %p608_p9  ;;  %p615_p2 = por %p614_p0, %p613_p1 }
  0x4a   : > { %p616_p12 = pnand %p615_p2, %p609_p10 }
  0x4c   : > { %619 = shalt.err (!%p616_p12)
}
  0x4d   : > { %s620_s7 = scalar_lea.vmem %s945_s20, 128  ;;  %s782_s8 = smov [#allocation6]  }
  0x4e   : > { %p621_p5 = scmp.ne.s32.totalorder %s945_s20, %s620_s7  ;;  %s625_s23 = sshll.u32 %s782_s8, 4  ;;  %s626_s23 = int_to_ptr.vmem [resolvable:$false] %s625_s23 }
  0x4f   : > { %s627_s0 = scalar_lea.vmem %s626_s23, 256  ;;  %p628_p6 = scmp.lt.s32.totalorder %s945_s20, %s626_s23 }
  0x50   : > { %p623_p9 = pnand %p621_p5, %p607_p7  ;;  %p629_p11 = scmp.lt.s32.totalorder %s627_s0, %s620_s7 }
  0x52   : > { %p624_p8 = pneg %p623_p9  ;;  %p630_p3 = por %p629_p11, %p628_p6 }
  0x54   : > { %p631_p1 = pnand %p630_p3, %p624_p8 }
  0x56   : > { %634 = shalt.err (!%p631_p1)
}
  0x57   : > { %482 = dma.hbm_to_vmem [thread:$0]  (!%p951_p13), %s943_s1, 128, %s945_s20, %s165_s25  }
  0x58   : > { %p1168_p6 = scmp.lt.s32.totalorder %s777_s18, 3  ;;  %p1169_p8 = scmp.ge.s32.totalorder %s777_s18, 1 }
  0x59   : > { %s81_s9 = sld [smem:[#allocation5]]  ;;  %s443_s10 = sld [smem:[#allocation5 + $0x1]] }
  0x5a   : > { %p986_p10 = pnand %p1169_p8, %p1168_p6  ;;  %p106_p12 = scmp.ne.s32.totalorder %s753_s12, %s749_s11 }
  0x5b   : > { %p112_p0 = scmp.ne.s32.totalorder %s749_s11, %s745_s2  ;;  %p1171_p2 = scmp.eq.s32.totalorder %s777_s18, 0 }
  0x5c   : > { %s94_s20 = ssub.s32 %s905_s26, %s917_s28  ;;  %s99_s25 = sadd.s32 1, %s753_s12 }
  0x5d   : > { %p996_p7 = por %p106_p12, %p1171_p2  ;;  %p1002_p13 = por %p112_p0, %p898_p4 }
  0x5e   : > { %s185_s7 = sand.u32 1, %s753_s12   ;;  %p1174_p11 = scmp.lt.s32.totalorder %s777_s18, 2 }
  0x5f   : > { %s1173_s1 = scalar_select %p1002_p13, 1, 0 }
  0x60   : > { %p83_p5 = scmp.gt.s32.totalorder %s81_s9, 0  ;;  %s450_s24 = sshll.u32 %s185_s7, 3 }
  0x61   : > { %s472_s2 = scalar_select %p996_p7, [#allocation3], [#allocation12] }
  0x62   : > { %s1195_s9 = smov (!%p83_p5, %s81_s9), 0  ;;  %p1175_p4 = pmov %p1174_p11 }
  0x63   : > { %s473_s8 = scalar_select %p996_p7, %s773_s17, 0 }
  0x64   : > { %p85_p9 = scmp.lt.s32.totalorder %s443_s10, %s1195_s9  ;;  %s1197_s2 = smov (!%p1174_p11, %s472_s2), [#allocation13] }
  0x65   : > { %s1201_s8 = smov (!%p1175_p4, %s473_s8), 0  ;;  %p97_p3 = scmp.eq.s32.totalorder %s94_s20, 0 }
  0x66   : > { %s1199_s10 = smov (!%p85_p9, %s443_s10), %s1195_s9  ;;  %s190_s23 = sld [smem:[%s1197_s2 + %s1201_s8]] }
  0x67   : > { %s189_s26 = scalar_lea.vmem [#allocation9], %s450_s24  ;;  %p1176_p1 = pmov %p1175_p4 }
  0x68   : > { %s206_s28 = sshll.u32 %s189_s26, 4  ;;  %s452_s21 = sshll.u32 %s1199_s10, 1  ;;  %s1030_s28 = int_to_ptr.vmem [resolvable:$true] %s206_s28 }
  0x69   : > { %p1023_p6 = pnand %p1176_p1, %p996_p7  ;;  %s186_s19 = scalar_lea.sflag [#allocation10], %s185_s7 }
  0x6a   : > { %s1028_s3 = scalar_select %p97_p3, %s753_s12, %s99_s25  }
  0x6b   : > { %p637_p12 = pneg %p1023_p6 }
  0x6c   : > { %s453_s17 = sshll.u32 %s190_s23, 1 }
  0x6d   : > { %s202_s29 = sadd.s32 %s453_s17, %s452_s21 }
  0x6e   : > { %s454_s9 = sshll.u32 %s202_s29, 6  ;;  %s640_s29 = scalar_lea.hbm %s1146_s4, 256 }
  0x6f   : > { %s1035_s8 = scalar_lea.hbm %s1146_s4, %s454_s9 }
  0x70   : > { %s635_s24 = scalar_lea.hbm %s1035_s8, 128  ;;  %p641_p7 = scmp.lt.u32.totalorder %s1035_s8, %s1146_s4 }
  0x71   : > { %p636_p8 = scmp.ne.s32.totalorder %s1035_s8, %s635_s24  ;;  %p642_p5 = scmp.lt.u32.totalorder %s640_s29, %s635_s24 }
  0x72   : > { %p644_p11 = scmp.lt.u32.totalorder %s635_s24, %s1035_s8 }
  0x73   : > { %p638_p0 = pnand %p637_p12, %p636_p8  ;;  %p643_p9 = por %p642_p5, %p641_p7 }
  0x75   : > { %p639_p2 = pneg %p638_p0  ;;  %p645_p4 = por %p644_p11, %p643_p9 }
  0x77   : > { %p646_p3 = pnand %p645_p4, %p639_p2 }
  0x79   : > { %649 = shalt.err (!%p646_p3)
}
  0x7a   : > { %s650_s7 = scalar_lea.vmem %s1030_s28, 128  ;;  %s783_s23 = smov [#allocation9]  }
  0x7b   : > { %p651_p1 = scmp.ne.s32.totalorder %s1030_s28, %s650_s7  ;;  %s655_s26 = sshll.u32 %s783_s23, 4  ;;  %s656_s26 = int_to_ptr.vmem [resolvable:$false] %s655_s26 }
  0x7c   : > { %s657_s9 = scalar_lea.vmem %s656_s26, 256  ;;  %p658_p13 = scmp.lt.s32.totalorder %s1030_s28, %s656_s26 }
  0x7d   : > { %p653_p8 = pnand %p651_p1, %p637_p12  ;;  %p659_p7 = scmp.lt.s32.totalorder %s657_s9, %s650_s7 }
  0x7f   : > { %p654_p0 = pneg %p653_p8  ;;  %p660_p5 = por %p659_p7, %p658_p13 }
  0x81   : > { %p661_p9 = pnand %p660_p5, %p654_p0 }
  0x83   : > { %664 = shalt.err (!%p661_p9)
}
  0x84   : > { %487 = dma.hbm_to_vmem [thread:$0]  (!%p1023_p6), %s1035_s8, 128, %s1030_s28, %s186_s19  }
  0x85   : > { %215 = sbr.rel (%p986_p10) target bundleno = 177 (0xb1), region = 28  ;;  %s1065_s2 = sand.u32 (!%p986_p10), 1, %s761_s14  }
  0x86   : > { %s456_s20 = sshll.u32 (!%p986_p10), %s1065_s2, 3  ;;  %s218_s24 = scalar_lea.sflag (!%p986_p10), [#allocation7], %s1065_s2 }
  0x87   : > { %s221_s17 = scalar_lea.vmem (!%p986_p10), [#allocation6], %s456_s20  ;;  %p1178_p13 = scmp.ne.s32.totalorder (!%p986_p10), %s1162_s27, 0 }
  0x8c   : > { %732 = dma.done.wait (%p1178_p13), %s218_s24, 128  }
  0x8d   : > { %734 = vsyncadd (%p1178_p13), %s218_s24, 4294967168  ;;  %s226_s22 = sand.u32 1, %s749_s11   ;;  %p1179_p10 = scmp.ne.s32.totalorder %s1173_s1, 0 }
  0x8e   : > { %s457_s28 = sshll.u32 %s226_s22, 3  ;;  %s227_s0 = scalar_lea.sflag [#allocation10], %s226_s22 }
  0x8f   : > { %s230_s8 = scalar_lea.vmem [#allocation9], %s457_s28 }
  0x90   : > { %736 = dma.done.wait (%p1179_p10), %s227_s0, 128  }
  0x91   : > { %738 = vsyncadd (%p1179_p10), %s227_s0, 4294967168  ;;  %v271_v0 = vlaneseq  ;;  %s266_s19 = sld [smem:[#allocation4]]  ;;  %s459_s21 = sld [smem:[#allocation4 + $0x1]]  ;;  %v299_v9 = vld [vmem:[%s230_s8] sm:$0xff]  ;;  %v300_v10 = vld [vmem:[%s221_s17] sm:$0xff] }
  0x92   : > { %s460_s29 = sld [smem:[#allocation4 + $0x2]]  ;;  %s461_s10 = sld [smem:[#allocation4 + $0x3]]  ;;  %v302_v11 = vcombine.high %v299_v9, %v299_v9  ;;  %v305_v12 = vcombine.high %v300_v10, %v300_v10 }
  0x93   : > { %v272_v1 = vand.u32 127, %v271_v0  ;;  %s255_s1 = scalar_lea.vmem [#allocation11], %s456_s20  ;;  %s470_s23 = sshll.u32 %s769_s16, 7 }
  0x94   : > { %s331_s7 = sshll.u32 %s255_s1, 4  ;;  %s1088_s24 = scalar_lea.hbm %s1147_s5, %s470_s23  ;;  %s1083_s7 = int_to_ptr.vmem [resolvable:$true] %s331_s7 }
  0x95   : > { %v273_v2 = vadd.s32 128, %v272_v1  ;;  %v287_v3 = vand.u32 15, %v272_v1  ;;  %s315_s17 = scalar_lea.sflag [#allocation8], %s1065_s2  ;;  %s665_s22 = scalar_lea.vmem %s1083_s7, 128 }
  0x96   : > { %p666_p6 = scmp.ne.s32.totalorder %s1083_s7, %s665_s22  ;;  %p1180_p12 = scmp.ne.s32.totalorder %s1164_s30, 0 }
  0x97   : > { %v288_v4 = vand.u32 15, %v273_v2  ;;  %s462_s27 = sshll.u32 %s266_s19, 4  ;;  %s463_s25 = sshll.u32 %s459_s21, 4 }
  0x98   : > { %v278_v5 = vstv %s462_s27  ;;  %v282_v6 = vstv %s463_s25  ;;  %v289_v7 = vstv %s460_s29  ;;  %v292_v8 = vstv %s461_s10  ;;  %p667_p2 = pnand %p666_p6, %p1180_p12  ;;  %s784_s16 = smov [#allocation11]  }
  0x99   : > { %vm279_vm0 = vcmp.ge.s32.totalorder %v272_v1, %v278_v5  ;;  %vm280_vm1 = vcmp.ge.s32.totalorder %v273_v2, %v278_v5  ;;  %vm283_vm2 = vcmp.lt.s32.totalorder %v272_v1, %v282_v6  ;;  %vm284_vm3 = vcmp.lt.s32.totalorder %v273_v2, %v282_v6  ;;  %s669_s20 = sshll.u32 %s784_s16, 4  ;;  %s670_s20 = int_to_ptr.vmem [resolvable:$false] %s669_s20 }
  0x9a   : > { %vm285_vm4 = vmand %vm279_vm0, %vm283_vm2  ;;  %vm290_vm5 = vcmp.ge.s32.totalorder %v287_v3, %v289_v7  ;;  %vm291_vm6 = vcmp.ge.s32.totalorder %v288_v4, %v289_v7  ;;  %vm293_vm7 = vcmp.lt.s32.totalorder %v287_v3, %v292_v8  ;;  %vm294_vm8 = vcmp.lt.s32.totalorder %v288_v4, %v292_v8  ;;  %p668_p11 = pneg %p667_p2  ;;  %s671_s28 = scalar_lea.vmem %s670_s20, 256 }
  0x9b   : > { %vm286_vm9 = vmand %vm280_vm1, %vm284_vm3  ;;  %p672_p4 = scmp.lt.s32.totalorder %s1083_s7, %s670_s20  ;;  %p673_p3 = scmp.lt.s32.totalorder %s671_s28, %s665_s22 }
  0x9c   : > { %vm295_vm10 = vmand %vm290_vm5, %vm293_vm7 }
  0x9d   : > { %vm296_vm11 = vmand %vm291_vm6, %vm294_vm8  ;;  %p674_p1 = por %p673_p3, %p672_p4 }
  0x9e   : > { %vm297_vm12 = vmand %vm285_vm4, %vm295_vm10 }
  0x9f   : > { %vm298_vm13 = vmand %vm286_vm9, %vm296_vm11  ;;  %v307_v13 = vsel %vm297_vm12, %v299_v9, %v300_v10  ;;  %p675_p8 = pnand %p674_p1, %p668_p11 }
  0xa0   : > { %v308_v14 = vsel %vm298_vm13, %v302_v11, %v305_v12 }
  0xa1   : > { %v311_v15 = vcombine.low %v307_v13, %v308_v14 }
  0xa3   : > { %313 = vst [vmem:[%s255_s1] sm:$0xff] %v311_v15 }
  0xa4   : > { %678 = shalt.err (!%p675_p8)
}
  0xa5   : > { %s679_s2 = scalar_lea.hbm %s1088_s24, 128  ;;  %s683_s19 = scalar_lea.hbm %s1147_s5, 256 }
  0xa6   : > { %p680_p0 = scmp.ne.s32.totalorder %s1088_s24, %s679_s2  ;;  %p684_p9 = scmp.lt.u32.totalorder %s1088_s24, %s1147_s5 }
  0xa7   : > { %p685_p13 = scmp.lt.u32.totalorder %s683_s19, %s679_s2  ;;  %p687_p6 = scmp.lt.u32.totalorder %s679_s2, %s1088_s24 }
  0xa8   : > { %p681_p7 = pnand %p680_p0, %p1180_p12 }
  0xa9   : > { %p686_p10 = por %p685_p13, %p684_p9 }
  0xaa   : > { %p682_p5 = pneg %p681_p7 }
  0xab   : > { %p688_p2 = por %p687_p6, %p686_p10 }
  0xad   : > { %p689_p11 = pnand %p688_p2, %p682_p5 }
  0xaf   : > { %692 = shalt.err (!%p689_p11)
}
  0xb0   : > { %477 = dma.vmem_to_hbm [thread:$0]  (%p1180_p12), %s1083_s7, 128, %s1088_s24, %s315_s17  }
  0xb1 PF: > { %s343_s10 = sand.u32 1, %s757_s13   ;;  %p1181_p4 = scmp.ne.s32.totalorder %s1165_s6, 0 }
  0xb2   : > { %p1182_p3 = scmp.ge.s32.totalorder %s777_s18, 2  ;;  %s344_s27 = scalar_lea.sflag [#allocation8], %s343_s10 }
  0xb4   : > { %p489_p1 = pnand %p1182_p3, %p1181_p4 }
  0xb6   : > { %740 = dma.done.wait (!%p489_p1), %s344_s27, 128  }
  0xb7   : > { %742 = vsyncadd (!%p489_p1), %s344_s27, 4294967168  ;;  %s36_s18 = sadd.s32 1, %s777_s18   ;;  %s1183_s30 = sld [smem:[#allocation20_spill]] }
  0xb8   : > { %p33_p8 = scmp.ge.s32.totalorder %s36_s18, 4   ;;  %s1184_s16 = sld [smem:[#allocation18_spill]] }
  0xb9   : > { %s1185_s17 = sld [smem:[#allocation19_spill]]  ;;  %s1186_s2 = smov %s749_s11 }
  0xba   : > { %s1187_s11 = smov %s753_s12  ;;  %s1188_s12 = smov %s1028_s3 }
  0xbb   : > { %s1189_s13 = smov %s761_s14  ;;  %s1190_s14 = smov %s765_s15 }
  0xbc   :  { %35 = sbr.rel (!%p33_p8) target bundleno = 43 (0x2b), region = 86 }
  0xbd   : > { %s1191_s15 = smov %s1183_s30 }
  0xc3   :  { %349 = vsyncpa [#allocation7], 1 }
  0xc4   :  { %351 = vsyncpa [#allocation7 + $0x1], 1 }
  0xc5   :  { %352 = vsyncpa [#allocation10], 1 }
  0xc6   :  { %354 = vsyncpa [#allocation10 + $0x1], 1 }
  0xc7   :  { %355 = vsyncpa [#allocation8], 1 }
  0xc8   :  { %357 = vsyncpa [#allocation8 + $0x1], 1 }

</bundles_post_ra>
